<compile_context>
chip_gen: v7x
topology: tpu7x:2x2x1
jax: 0.10.0
libtpu: 0.0.40
codegen_flags: <defaults>
</compile_context>

<pallas_src>
import jax
import jax.numpy as jnp
from jax.experimental import pallas as pl
from jax.experimental.pallas import tpu as pltpu

LANE = 128
SUBLANE = 8
EPS = 1e-5
FUSED_VMEM_BUDGET = 10 * 1024 * 1024   # use the fused path below this footprint


def _round_up(v, m):
    return (v + m - 1) // m * m


def _pad2(a, rows, cols, dtype=jnp.float32):
    a = a.astype(dtype)
    return jnp.pad(a, ((0, rows - a.shape[0]), (0, cols - a.shape[1])))


def _vmem_limit_bytes():
    """Generation-aware scoped-VMEM cap: ~3/4 of physical, at most 100 MiB."""
    try:
        cap = int(pltpu.get_tpu_info().vmem_capacity_bytes)
    except Exception:                              # CPU / interpret / old runtime
        cap = 64 * 1024 * 1024
    return int(min(cap * 3 // 4, 100 * 1024 * 1024))


# --------------------------------------------------------------------------
# Graph preprocessing (plain JAX)
# --------------------------------------------------------------------------

def build_normalized_adjacency(edge_index, num_nodes):
    """Dense GCN-normalized adjacency: D^-1/2 (A + I) D^-1/2 (f32)."""
    # TODO(synk): for large graphs build A_hat from edge_index as a block-sparse
    # SpMM (scalar-prefetched row pointers + manual DMA gathers) instead of a
    # dense O(N^2) matrix.
    src, dst = edge_index[0], edge_index[1]
    a = jnp.zeros((num_nodes, num_nodes), jnp.float32).at[dst, src].add(1.0)
    a = a + jnp.eye(num_nodes, dtype=jnp.float32)          # self loops
    deg = jnp.sum(a, axis=1)
    dinv = jnp.where(deg > 0, jax.lax.rsqrt(deg), 0.0)
    return dinv[:, None] * a * dinv[None, :]


# --------------------------------------------------------------------------
# Fused small-graph kernel (everything resident in VMEM, grid=(1,))
# --------------------------------------------------------------------------

def make_fused_kernel(n_nodes, c_hidden):
    inv_n = 1.0 / float(n_nodes)
    inv_cnt = 1.0 / float(n_nodes * c_hidden)

    def kernel(x_ref, a_ref, bn_g_ref, bn_b_ref, w1_ref, b1_ref,
               ln_g_ref, ln_b_ref, w2_ref, b2_ref, o_ref):
        x = x_ref[...]
        a = a_ref[...]

        # BatchNorm (training-mode batch stats, biased variance). Padded rows /
        # lanes of x are zero so the padded sums are exact; divide by real n.
        mu = jnp.sum(x, axis=0, keepdims=True) * inv_n
        var = jnp.maximum(
            jnp.sum(x * x, axis=0, keepdims=True) * inv_n - mu * mu, 0.0)
        xb = (x - mu) * jax.lax.rsqrt(var + EPS) * bn_g_ref[...] + bn_b_ref[...]

        # GCNConv1 + ReLU.
        h = jnp.dot(xb, w1_ref[...], preferred_element_type=jnp.float32)
        h = jnp.dot(a, h, preferred_element_type=jnp.float32) + b1_ref[...]
        h = jnp.maximum(h, 0.0)
        # Zero padded rows so graph-mode LayerNorm statistics stay exact.
        rows = jax.lax.broadcasted_iota(jnp.int32, h.shape, 0)
        h = jnp.where(rows < n_nodes, h, 0.0)

        # LayerNorm, PyG 'graph' mode: scalar mean / biased std over all
        # nodes x channels, eps added OUTSIDE the sqrt.
        s = jnp.sum(jnp.sum(h, axis=0, keepdims=True), axis=1, keepdims=True)
        ss = jnp.sum(jnp.sum(h * h, axis=0, keepdims=True), axis=1, keepdims=True)
        m = s * inv_cnt
        v = jnp.maximum(ss * inv_cnt - m * m, 0.0)
        inv_std = 1.0 / (jnp.sqrt(v) + EPS)
        hn = (h - m) * inv_std * ln_g_ref[...] + ln_b_ref[...]

        # GCNConv2 + ReLU.
        o = jnp.dot(hn, w2_ref[...], preferred_element_type=jnp.float32)
        o = jnp.dot(a, o, preferred_element_type=jnp.float32) + b2_ref[...]
        o_ref[...] = jnp.maximum(o, 0.0)

    return kernel


def _fused_forward(x, a, params, n, c_hidden, c_out, vmem_limit):
    bn_g, bn_b, w1, b1, ln_g, ln_b, w2, b2 = params
    n_pad = _round_up(n, SUBLANE)                  # rows only to the sublane
    ci_p = _round_up(x.shape[1], LANE)
    ch_p = _round_up(c_hidden, LANE)
    co_p = _round_up(c_out, LANE)

    operands = (
        _pad2(x, n_pad, ci_p),
        _pad2(a, n_pad, n_pad),
        _pad2(bn_g, 1, ci_p), _pad2(bn_b, 1, ci_p),
        _pad2(w1, ci_p, ch_p), _pad2(b1, 1, ch_p),
        _pad2(ln_g, 1, ch_p), _pad2(ln_b, 1, ch_p),
        _pad2(w2, ch_p, co_p), _pad2(b2, 1, co_p),
    )

    out_p = pl.pallas_call(
        make_fused_kernel(n, c_hidden),
        out_shape=jax.ShapeDtypeStruct((n_pad, co_p), jnp.float32),
        grid=(1,),
        in_specs=[pl.BlockSpec(op.shape, lambda i: (0, 0)) for op in operands],
        out_specs=pl.BlockSpec((n_pad, co_p), lambda i: (0, 0)),
        compiler_params=pltpu.CompilerParams(
            dimension_semantics=("arbitrary",),
            vmem_limit_bytes=vmem_limit),
    )(*operands)

    return out_p[:n, :c_out]


# --------------------------------------------------------------------------
# Tiled large-graph kernels
# --------------------------------------------------------------------------

def moments_kernel(x_ref, sum_ref, sumsq_ref):
    """Per-channel sum / sum-of-squares accumulated over node row tiles."""
    @pl.when(pl.program_id(0) == 0)
    def _():
        sum_ref[...] = jnp.zeros_like(sum_ref)
        sumsq_ref[...] = jnp.zeros_like(sumsq_ref)

    x = x_ref[...]
    sum_ref[...] += jnp.sum(x, axis=0, keepdims=True)
    sumsq_ref[...] += jnp.sum(x * x, axis=0, keepdims=True)


def affine_matmul_kernel(x_ref, scale_ref, shift_ref, w_ref, o_ref):
    """(x * scale + shift) @ W with bf16 MXU operands, f32 accumulation."""
    xb = x_ref[...].astype(jnp.float32) * scale_ref[...] + shift_ref[...]
    o_ref[...] = jnp.dot(xb.astype(jnp.bfloat16), w_ref[...],
                         preferred_element_type=jnp.float32).astype(o_ref.dtype)


def make_gcn_agg_moments_kernel(n_nodes, tile_m, tile_k):
    """ReLU(A_hat @ H + b) with resident H; also emits per-row-tile LN moments."""
    def kernel(a_ref, h_ref, b_ref, o_ref, mom_ref, acc_ref):
        k = pl.program_id(1)
        # NOTE: program_id stays OUT of pl.when bodies (compile fix).
        row_base = pl.program_id(0) * tile_m
        rows = jax.lax.broadcasted_iota(jnp.int32, acc_ref.shape, 0) + row_base

        @pl.when(k == 0)
        def _():
            acc_ref[...] = jnp.zeros_like(acc_ref)

        start = pl.multiple_of(k * tile_k, tile_k)
        hk = h_ref[pl.ds(start, tile_k), :]
        acc_ref[...] += jnp.dot(a_ref[...], hk, preferred_element_type=jnp.float32)

        @pl.when(k == pl.num_programs(1) - 1)
        def _():
            val = jnp.maximum(acc_ref[...] + b_ref[...], 0.0)
            val = jnp.where(rows < n_nodes, val, 0.0)   # exact graph-LN stats
            o_ref[...] = val.astype(o_ref.dtype)
            mom_ref[...] = jnp.concatenate(
                [jnp.sum(val, axis=0, keepdims=True),
                 jnp.sum(val * val, axis=0, keepdims=True)], axis=0)[None]

    return kernel


def make_gcn_agg_final_kernel(tile_k):
    """ReLU(A_hat @ H + b), accumulating directly into the resident output block."""
    def kernel(a_ref, h_ref, b_ref, o_ref):
        k = pl.program_id(1)

        @pl.when(k == 0)
        def _():
            o_ref[...] = jnp.zeros_like(o_ref)

        start = pl.multiple_of(k * tile_k, tile_k)
        hk = h_ref[pl.ds(start, tile_k), :]
        o_ref[...] += jnp.dot(a_ref[...], hk, preferred_element_type=jnp.float32)

        @pl.when(k == pl.num_programs(1) - 1)
        def _():
            o_ref[...] = jnp.maximum(o_ref[...] + b_ref[...], 0.0)

    return kernel


def _tiled_forward(x, a, params, n, c_hidden, c_out, vmem_limit):
    bn_g, bn_b, w1, b1, ln_g, ln_b, w2, b2 = params
    f32, bf16 = jnp.float32, jnp.bfloat16

    tile_m, tile_k = 256, 512          # 512-wide A_hat k stream; nt_m >= 2 (megacore)
    n_pad = _round_up(n, tile_k)
    ci_p = _round_up(x.shape[1], LANE)
    ch_p = _round_up(c_hidden, LANE)
    co_p = _round_up(c_out, LANE)
    nt_m, nt_k = n_pad // tile_m, n_pad // tile_k

    x_p = _pad2(x, n_pad, ci_p)
    # TODO(synk): on v7x A_hat could be stored as fp8 (e4m3) to halve the
    # dominant HBM stream; kept bf16 here for v5e/v6e parity.
    a_p = _pad2(a, n_pad, n_pad, bf16)
    bn_g_p, bn_b_p = _pad2(bn_g, 1, ci_p), _pad2(bn_b, 1, ci_p)
    w1_p, b1_p = _pad2(w1, ci_p, ch_p, bf16), _pad2(b1, 1, ch_p)
    ln_g_p, ln_b_p = _pad2(ln_g, 1, ch_p), _pad2(ln_b, 1, ch_p)
    w2_p, b2_p = _pad2(w2, ch_p, co_p, bf16), _pad2(b2, 1, co_p)

    cp_arb = pltpu.CompilerParams(dimension_semantics=("arbitrary",),
                                  vmem_limit_bytes=vmem_limit)
    cp_par = pltpu.CompilerParams(dimension_semantics=("parallel",),
                                  vmem_limit_bytes=vmem_limit)
    cp_mm = pltpu.CompilerParams(dimension_semantics=("parallel", "arbitrary"),
                                 vmem_limit_bytes=vmem_limit)

    def affine_matmul(h, scale, shift, w, out_dtype):
        cin, cout = w.shape
        return pl.pallas_call(
            affine_matmul_kernel,
            out_shape=jax.ShapeDtypeStruct((n_pad, cout), out_dtype),
            grid=(nt_m,),
            in_specs=[pl.BlockSpec((tile_m, cin), lambda i: (i, 0)),
                      pl.BlockSpec((1, cin), lambda i: (0, 0)),
                      pl.BlockSpec((1, cin), lambda i: (0, 0)),
                      pl.BlockSpec((cin, cout), lambda i: (0, 0))],
            out_specs=pl.BlockSpec((tile_m, cout), lambda i: (i, 0)),
            compiler_params=cp_par,
        )(h, scale, shift, w)

    # 1) BatchNorm batch statistics of x.
    x_sum, x_sumsq = pl.pallas_call(
        moments_kernel,
        out_shape=(jax.ShapeDtypeStruct((1, ci_p), f32),
                   jax.ShapeDtypeStruct((1, ci_p), f32)),
        grid=(nt_m,),
        in_specs=[pl.BlockSpec((tile_m, ci_p), lambda i: (i, 0))],
        out_specs=(pl.BlockSpec((1, ci_p), lambda i: (0, 0)),
                   pl.BlockSpec((1, ci_p), lambda i: (0, 0))),
        compiler_params=cp_arb,
    )(x_p)

    # Fold BN stats + affine into per-channel scale/shift (tiny, plain JAX).
    mu = x_sum / n
    var = jnp.maximum(x_sumsq / n - mu * mu, 0.0)
    bn_scale = bn_g_p * jax.lax.rsqrt(var + EPS)
    bn_shift = bn_b_p - mu * bn_scale

    # 2) h0 = BN(x) @ W1   (bf16 intermediate)
    h0 = affine_matmul(x_p, bn_scale, bn_shift, w1_p, bf16)

    # 3) h1 = ReLU(A_hat @ h0 + b1)  (bf16) + per-row-tile LayerNorm moments.
    h1, mom = pl.pallas_call(
        make_gcn_agg_moments_kernel(n, tile_m, tile_k),
        out_shape=(jax.ShapeDtypeStruct((n_pad, ch_p), bf16),
                   jax.ShapeDtypeStruct((nt_m, 2, ch_p), f32)),
        grid=(nt_m, nt_k),
        in_specs=[pl.BlockSpec((tile_m, tile_k), lambda i, k: (i, k)),
                  pl.BlockSpec((n_pad, ch_p), lambda i, k: (0, 0)),   # resident H
                  pl.BlockSpec((1, ch_p), lambda i, k: (0, 0))],
        out_specs=(pl.BlockSpec((tile_m, ch_p), lambda i, k: (i, 0)),
                   pl.BlockSpec((1, 2, ch_p), lambda i, k: (i, 0, 0))),
        scratch_shapes=[pltpu.VMEM((tile_m, ch_p), f32)],
        compiler_params=cp_mm,
    )(a_p, h0, b1_p)

    # Graph-mode LayerNorm: scalar mean / biased std over the n*c_hidden real
    # elements (padded rows/lanes were zeroed in the kernel), eps outside sqrt.
    cnt = float(n * c_hidden)
    m = jnp.sum(mom[:, 0, :]) / cnt
    v = jnp.maximum(jnp.sum(mom[:, 1, :]) / cnt - m * m, 0.0)
    inv_std = 1.0 / (jnp.sqrt(v) + EPS)
    ln_scale = ln_g_p * inv_std
    ln_shift = ln_b_p - m * ln_scale

    # 4) h2 = LayerNorm(h1) @ W2   (bf16 intermediate)
    h2 = affine_matmul(h1, ln_scale, ln_shift, w2_p, bf16)

    # 5) out = ReLU(A_hat @ h2 + b2)   (f32, accumulated directly in the output)
    out_p = pl.pallas_call(
        make_gcn_agg_final_kernel(tile_k),
        out_shape=jax.ShapeDtypeStruct((n_pad, co_p), f32),
        grid=(nt_m, nt_k),
        in_specs=[pl.BlockSpec((tile_m, tile_k), lambda i, k: (i, k)),
                  pl.BlockSpec((n_pad, co_p), lambda i, k: (0, 0)),   # resident H
                  pl.BlockSpec((1, co_p), lambda i, k: (0, 0))],
        out_specs=pl.BlockSpec((tile_m, co_p), lambda i, k: (i, 0)),
        compiler_params=cp_mm,
    )(a_p, h2, b2_p)

    return out_p[:n, :c_out]


# --------------------------------------------------------------------------
# Forward dispatch
# --------------------------------------------------------------------------

def reco_anomaly_forward(x, edge_index, params):
    """x: (N, C_in) float32, edge_index: (2, E) int32 -> (N, C_out) float32."""
    n, c_in = x.shape
    w1, w2 = params[2], params[6]
    c_hidden, c_out = w1.shape[1], w2.shape[1]

    a = build_normalized_adjacency(edge_index, n)
    vmem_limit = _vmem_limit_bytes()

    ci_p = _round_up(c_in, LANE)
    ch_p = _round_up(c_hidden, LANE)
    co_p = _round_up(c_out, LANE)
    n_pad_small = _round_up(n, SUBLANE)
    fused_bytes = 4 * (n_pad_small * n_pad_small
                       + n_pad_small * (ci_p + 2 * ch_p + co_p)
                       + ci_p * ch_p + ch_p * co_p)

    if fused_bytes <= FUSED_VMEM_BUDGET:
        return _fused_forward(x, a, params, n, c_hidden, c_out, vmem_limit)
    return _tiled_forward(x, a, params, n, c_hidden, c_out, vmem_limit)


# --------------------------------------------------------------------------
# Parameters & pure-JAX reference
# --------------------------------------------------------------------------

def init_params(key, in_channels, out_channels):
    layer1_out = in_channels - int((in_channels - out_channels) / 2)
    k1, k2 = jax.random.split(key, 2)

    def glorot(k, fan_in, fan_out):
        lim = jnp.sqrt(6.0 / (fan_in + fan_out))
        return jax.random.uniform(k, (fan_in, fan_out), jnp.float32, -lim, lim)

    bn_g = jnp.ones((1, in_channels), jnp.float32)        # BatchNorm weight
    bn_b = jnp.zeros((1, in_channels), jnp.float32)       # BatchNorm bias
    w1 = glorot(k1, in_channels, layer1_out)              # GCNConv1 weight
    b1 = jnp.zeros((1, layer1_out), jnp.float32)          # GCNConv1 bias
    ln_g = jnp.ones((1, layer1_out), jnp.float32)         # LayerNorm weight
    ln_b = jnp.zeros((1, layer1_out), jnp.float32)        # LayerNorm bias
    w2 = glorot(k2, layer1_out, out_channels)             # GCNConv2 weight
    b2 = jnp.zeros((1, out_channels), jnp.float32)        # GCNConv2 bias
    return (bn_g, bn_b, w1, b1, ln_g, ln_b, w2, b2)


def reference_forward(x, edge_index, params):
    """Pure-JAX float32 reference of the original PyTorch forward."""
    bn_g, bn_b, w1, b1, ln_g, ln_b, w2, b2 = params
    a = build_normalized_adjacency(edge_index, x.shape[0])
    hp = jax.lax.Precision.HIGHEST
    mu = jnp.mean(x, axis=0, keepdims=True)
    var = jnp.mean((x - mu) ** 2, axis=0, keepdims=True)
    xb = (x - mu) * jax.lax.rsqrt(var + EPS) * bn_g + bn_b
    h = jnp.dot(a, jnp.dot(xb, w1, precision=hp), precision=hp) + b1
    h = jnp.maximum(h, 0.0)
    m = jnp.mean(h)
    v = jnp.mean((h - m) ** 2)
    hn = (h - m) / (jnp.sqrt(v) + EPS) * ln_g + ln_b
    o = jnp.dot(a, jnp.dot(hn, w2, precision=hp), precision=hp) + b2
    return jnp.maximum(o, 0.0)


if __name__ == "__main__":
    key = jax.random.PRNGKey(0)
    kx, kp = jax.random.split(key)

    num_nodes = 16
    in_channels = 16
    out_channels = 8      # layer1_out = 12

    x = jax.random.normal(kx, (num_nodes, in_channels), jnp.float32)

    # Deterministic undirected ring graph: i <-> (i+1) % N  (32 directed edges)
    idx = jnp.arange(num_nodes, dtype=jnp.int32)
    nxt = (idx + 1) % num_nodes
    edge_index = jnp.stack([jnp.concatenate([idx, nxt]),
                            jnp.concatenate([nxt, idx])], axis=0)

    params = init_params(kp, in_channels, out_channels)

    out = reco_anomaly_forward(x, edge_index, params)
    out = jax.block_until_ready(out)
    assert out.shape == (num_nodes, out_channels)

    ref = jax.block_until_ready(reference_forward(x, edge_index, params))
    max_err = float(jnp.max(jnp.abs(out - ref)))
    assert max_err < 5e-2, f"kernel/reference mismatch: max_err={max_err}"

    print("KERNEL_OK")
</pallas_src>

<mosaic_0001>
module attributes {stable_mosaic.version = 11 : i64} {
  func.func @kernel(%arg0: i32, %arg1: memref<16x128xf32, #tpu.memory_space<vmem>>, %arg2: memref<16x16xf32, #tpu.memory_space<vmem>>, %arg3: memref<1x128xf32, #tpu.memory_space<vmem>>, %arg4: memref<1x128xf32, #tpu.memory_space<vmem>>, %arg5: memref<128x128xf32, #tpu.memory_space<vmem>>, %arg6: memref<1x128xf32, #tpu.memory_space<vmem>>, %arg7: memref<1x128xf32, #tpu.memory_space<vmem>>, %arg8: memref<1x128xf32, #tpu.memory_space<vmem>>, %arg9: memref<128x128xf32, #tpu.memory_space<vmem>>, %arg10: memref<1x128xf32, #tpu.memory_space<vmem>>, %arg11: memref<16x128xf32, #tpu.memory_space<vmem>>) attributes {dimension_semantics = [#tpu.dimension_semantics<arbitrary>], iteration_bounds = array<i64: 1>, scalar_prefetch = 0 : i64, scratch_operands = 0 : i64, tpu.core_type = #tpu.core_type<tc>, window_params = [{pipeline_mode = #tpu.pipeline_mode<synchronous>, transform_indices = @transform_0, window_bounds = array<i64: 16, 128>}, {pipeline_mode = #tpu.pipeline_mode<synchronous>, transform_indices = @transform_1, window_bounds = array<i64: 16, 16>}, {pipeline_mode = #tpu.pipeline_mode<synchronous>, transform_indices = @transform_2, window_bounds = array<i64: 1, 128>}, {pipeline_mode = #tpu.pipeline_mode<synchronous>, transform_indices = @transform_3, window_bounds = array<i64: 1, 128>}, {pipeline_mode = #tpu.pipeline_mode<synchronous>, transform_indices = @transform_4, window_bounds = array<i64: 128, 128>}, {pipeline_mode = #tpu.pipeline_mode<synchronous>, transform_indices = @transform_5, window_bounds = array<i64: 1, 128>}, {pipeline_mode = #tpu.pipeline_mode<synchronous>, transform_indices = @transform_6, window_bounds = array<i64: 1, 128>}, {pipeline_mode = #tpu.pipeline_mode<synchronous>, transform_indices = @transform_7, window_bounds = array<i64: 1, 128>}, {pipeline_mode = #tpu.pipeline_mode<synchronous>, transform_indices = @transform_8, window_bounds = array<i64: 128, 128>}, {pipeline_mode = #tpu.pipeline_mode<synchronous>, transform_indices = @transform_9, window_bounds = array<i64: 1, 128>}, {pipeline_mode = #tpu.pipeline_mode<synchronous>, transform_indices = @transform_10, window_bounds = array<i64: 16, 128>}]} {
    %c0 = arith.constant 0 : index
    %c0_0 = arith.constant 0 : index
    %0 = vector.load %arg1[%c0, %c0_0] : memref<16x128xf32, #tpu.memory_space<vmem>>, vector<16x128xf32>
    %c0_1 = arith.constant 0 : index
    %c0_2 = arith.constant 0 : index
    %1 = vector.load %arg2[%c0_1, %c0_2] : memref<16x16xf32, #tpu.memory_space<vmem>>, vector<16x16xf32>
    %cst = arith.constant dense<0.000000e+00> : vector<128xf32>
    %2 = vector.multi_reduction <add>, %0, %cst [0] : vector<16x128xf32> to vector<128xf32>
    %3 = vector.shape_cast %2 : vector<128xf32> to vector<1x128xf32>
    %cst_3 = arith.constant 6.250000e-02 : f32
    %4 = vector.broadcast %cst_3 : f32 to vector<1x128xf32>
    %5 = arith.mulf %3, %4 : vector<1x128xf32>
    %6 = arith.mulf %0, %0 : vector<16x128xf32>
    %cst_4 = arith.constant dense<0.000000e+00> : vector<128xf32>
    %7 = vector.multi_reduction <add>, %6, %cst_4 [0] : vector<16x128xf32> to vector<128xf32>
    %8 = vector.shape_cast %7 : vector<128xf32> to vector<1x128xf32>
    %cst_5 = arith.constant 6.250000e-02 : f32
    %9 = vector.broadcast %cst_5 : f32 to vector<1x128xf32>
    %10 = arith.mulf %8, %9 : vector<1x128xf32>
    %11 = arith.mulf %5, %5 : vector<1x128xf32>
    %12 = arith.subf %10, %11 : vector<1x128xf32>
    %cst_6 = arith.constant 0.000000e+00 : f32
    %13 = vector.broadcast %cst_6 : f32 to vector<1x128xf32>
    %14 = arith.maximumf %12, %13 : vector<1x128xf32>
    %15 = vector.broadcast %5 : vector<1x128xf32> to vector<16x128xf32>
    %16 = arith.subf %0, %15 : vector<16x128xf32>
    %cst_7 = arith.constant 9.99999974E-6 : f32
    %17 = vector.broadcast %cst_7 : f32 to vector<1x128xf32>
    %18 = arith.addf %14, %17 : vector<1x128xf32>
    %19 = math.rsqrt %18 : vector<1x128xf32>
    %20 = vector.broadcast %19 : vector<1x128xf32> to vector<16x128xf32>
    %21 = arith.mulf %16, %20 : vector<16x128xf32>
    %c0_8 = arith.constant 0 : index
    %c0_9 = arith.constant 0 : index
    %22 = vector.load %arg3[%c0_8, %c0_9] : memref<1x128xf32, #tpu.memory_space<vmem>>, vector<1x128xf32>
    %23 = vector.broadcast %22 : vector<1x128xf32> to vector<16x128xf32>
    %24 = arith.mulf %21, %23 : vector<16x128xf32>
    %c0_10 = arith.constant 0 : index
    %c0_11 = arith.constant 0 : index
    %25 = vector.load %arg4[%c0_10, %c0_11] : memref<1x128xf32, #tpu.memory_space<vmem>>, vector<1x128xf32>
    %26 = vector.broadcast %25 : vector<1x128xf32> to vector<16x128xf32>
    %27 = arith.addf %24, %26 : vector<16x128xf32>
    %c0_12 = arith.constant 0 : index
    %c0_13 = arith.constant 0 : index
    %28 = vector.load %arg5[%c0_12, %c0_13] : memref<128x128xf32, #tpu.memory_space<vmem>>, vector<128x128xf32>
    %cst_14 = arith.constant dense<0.000000e+00> : vector<16x128xf32>
    %29 = tpu.matmul %27, %28, %cst_14 {dimension_numbers = #tpu.dot_dimension_numbers<[1], [0], [0], [1], [0, 0, 1, 1], [], []>} : vector<16x128xf32>, vector<128x128xf32>, vector<16x128xf32> -> vector<16x128xf32>
    %cst_15 = arith.constant dense<0.000000e+00> : vector<16x128xf32>
    %30 = tpu.matmul %1, %29, %cst_15 {dimension_numbers = #tpu.dot_dimension_numbers<[1], [0], [0], [1], [0, 0, 1, 1], [], []>} : vector<16x16xf32>, vector<16x128xf32>, vector<16x128xf32> -> vector<16x128xf32>
    %c0_16 = arith.constant 0 : index
    %c0_17 = arith.constant 0 : index
    %31 = vector.load %arg6[%c0_16, %c0_17] : memref<1x128xf32, #tpu.memory_space<vmem>>, vector<1x128xf32>
    %32 = vector.broadcast %31 : vector<1x128xf32> to vector<16x128xf32>
    %33 = arith.addf %30, %32 : vector<16x128xf32>
    %cst_18 = arith.constant 0.000000e+00 : f32
    %34 = vector.broadcast %cst_18 : f32 to vector<16x128xf32>
    %35 = arith.maximumf %33, %34 : vector<16x128xf32>
    %36 = tpu.iota {dimensions = array<i32: 0>} : vector<16x128xi32>
    %c16_i32 = arith.constant 16 : i32
    %37 = vector.broadcast %c16_i32 : i32 to vector<16x128xi32>
    %38 = arith.cmpi slt, %36, %37 : vector<16x128xi32>
    %cst_19 = arith.constant 0.000000e+00 : f32
    %39 = vector.broadcast %cst_19 : f32 to vector<16x128xf32>
    %40 = arith.select %38, %35, %39 : vector<16x128xi1>, vector<16x128xf32>
    %cst_20 = arith.constant dense<0.000000e+00> : vector<128xf32>
    %41 = vector.multi_reduction <add>, %40, %cst_20 [0] : vector<16x128xf32> to vector<128xf32>
    %42 = vector.shape_cast %41 : vector<128xf32> to vector<1x128xf32>
    %cst_21 = arith.constant dense<0.000000e+00> : vector<1xf32>
    %43 = vector.multi_reduction <add>, %42, %cst_21 [1] : vector<1x128xf32> to vector<1xf32>
    %44 = vector.shape_cast %43 : vector<1xf32> to vector<1x1xf32>
    %45 = arith.mulf %40, %40 : vector<16x128xf32>
    %cst_22 = arith.constant dense<0.000000e+00> : vector<128xf32>
    %46 = vector.multi_reduction <add>, %45, %cst_22 [0] : vector<16x128xf32> to vector<128xf32>
    %47 = vector.shape_cast %46 : vector<128xf32> to vector<1x128xf32>
    %cst_23 = arith.constant dense<0.000000e+00> : vector<1xf32>
    %48 = vector.multi_reduction <add>, %47, %cst_23 [1] : vector<1x128xf32> to vector<1xf32>
    %49 = vector.shape_cast %48 : vector<1xf32> to vector<1x1xf32>
    %cst_24 = arith.constant 0.00520833349 : f32
    %50 = vector.broadcast %cst_24 : f32 to vector<1x1xf32>
    %51 = arith.mulf %44, %50 : vector<1x1xf32>
    %cst_25 = arith.constant 0.00520833349 : f32
    %52 = vector.broadcast %cst_25 : f32 to vector<1x1xf32>
    %53 = arith.mulf %49, %52 : vector<1x1xf32>
    %54 = arith.mulf %51, %51 : vector<1x1xf32>
    %55 = arith.subf %53, %54 : vector<1x1xf32>
    %cst_26 = arith.constant 0.000000e+00 : f32
    %56 = vector.broadcast %cst_26 : f32 to vector<1x1xf32>
    %57 = arith.maximumf %55, %56 : vector<1x1xf32>
    %58 = math.sqrt %57 : vector<1x1xf32>
    %cst_27 = arith.constant 9.99999974E-6 : f32
    %59 = vector.broadcast %cst_27 : f32 to vector<1x1xf32>
    %60 = arith.addf %58, %59 : vector<1x1xf32>
    %cst_28 = arith.constant 1.000000e+00 : f32
    %61 = vector.broadcast %cst_28 : f32 to vector<1x1xf32>
    %62 = arith.divf %61, %60 : vector<1x1xf32>
    %63 = vector.broadcast %51 : vector<1x1xf32> to vector<16x128xf32>
    %64 = arith.subf %40, %63 : vector<16x128xf32>
    %65 = vector.broadcast %62 : vector<1x1xf32> to vector<16x128xf32>
    %66 = arith.mulf %64, %65 : vector<16x128xf32>
    %c0_29 = arith.constant 0 : index
    %c0_30 = arith.constant 0 : index
    %67 = vector.load %arg7[%c0_29, %c0_30] : memref<1x128xf32, #tpu.memory_space<vmem>>, vector<1x128xf32>
    %68 = vector.broadcast %67 : vector<1x128xf32> to vector<16x128xf32>
    %69 = arith.mulf %66, %68 : vector<16x128xf32>
    %c0_31 = arith.constant 0 : index
    %c0_32 = arith.constant 0 : index
    %70 = vector.load %arg8[%c0_31, %c0_32] : memref<1x128xf32, #tpu.memory_space<vmem>>, vector<1x128xf32>
    %71 = vector.broadcast %70 : vector<1x128xf32> to vector<16x128xf32>
    %72 = arith.addf %69, %71 : vector<16x128xf32>
    %c0_33 = arith.constant 0 : index
    %c0_34 = arith.constant 0 : index
    %73 = vector.load %arg9[%c0_33, %c0_34] : memref<128x128xf32, #tpu.memory_space<vmem>>, vector<128x128xf32>
    %cst_35 = arith.constant dense<0.000000e+00> : vector<16x128xf32>
    %74 = tpu.matmul %72, %73, %cst_35 {dimension_numbers = #tpu.dot_dimension_numbers<[1], [0], [0], [1], [0, 0, 1, 1], [], []>} : vector<16x128xf32>, vector<128x128xf32>, vector<16x128xf32> -> vector<16x128xf32>
    %cst_36 = arith.constant dense<0.000000e+00> : vector<16x128xf32>
    %75 = tpu.matmul %1, %74, %cst_36 {dimension_numbers = #tpu.dot_dimension_numbers<[1], [0], [0], [1], [0, 0, 1, 1], [], []>} : vector<16x16xf32>, vector<16x128xf32>, vector<16x128xf32> -> vector<16x128xf32>
    %c0_37 = arith.constant 0 : index
    %c0_38 = arith.constant 0 : index
    %76 = vector.load %arg10[%c0_37, %c0_38] : memref<1x128xf32, #tpu.memory_space<vmem>>, vector<1x128xf32>
    %77 = vector.broadcast %76 : vector<1x128xf32> to vector<16x128xf32>
    %78 = arith.addf %75, %77 : vector<16x128xf32>
    %cst_39 = arith.constant 0.000000e+00 : f32
    %79 = vector.broadcast %cst_39 : f32 to vector<16x128xf32>
    %80 = arith.maximumf %78, %79 : vector<16x128xf32>
    %c0_40 = arith.constant 0 : index
    %c0_41 = arith.constant 0 : index
    %81 = vector.load %arg11[%c0_40, %c0_41] : memref<16x128xf32, #tpu.memory_space<vmem>>, vector<16x128xf32>
    tpu.vector_store %arg11[%c0_40, %c0_41], %80 {strides = array<i32>} : memref<16x128xf32, #tpu.memory_space<vmem>>, vector<16x128xf32>,
    return
  }
  func.func @transform_0(%arg0: i32) -> (i32, i32) {
    %c0_i32 = arith.constant 0 : i32
    %c0_i32_0 = arith.constant 0 : i32
    %c0_i32_1 = arith.constant 0 : i32
    return %c0_i32, %c0_i32_0 : i32, i32
  }
  func.func @transform_1(%arg0: i32) -> (i32, i32) {
    %c0_i32 = arith.constant 0 : i32
    %c0_i32_0 = arith.constant 0 : i32
    %c0_i32_1 = arith.constant 0 : i32
    return %c0_i32, %c0_i32_0 : i32, i32
  }
  func.func @transform_2(%arg0: i32) -> (i32, i32) {
    %c0_i32 = arith.constant 0 : i32
    %c0_i32_0 = arith.constant 0 : i32
    %c0_i32_1 = arith.constant 0 : i32
    return %c0_i32, %c0_i32_0 : i32, i32
  }
  func.func @transform_3(%arg0: i32) -> (i32, i32) {
    %c0_i32 = arith.constant 0 : i32
    %c0_i32_0 = arith.constant 0 : i32
    %c0_i32_1 = arith.constant 0 : i32
    return %c0_i32, %c0_i32_0 : i32, i32
  }
  func.func @transform_4(%arg0: i32) -> (i32, i32) {
    %c0_i32 = arith.constant 0 : i32
    %c0_i32_0 = arith.constant 0 : i32
    %c0_i32_1 = arith.constant 0 : i32
    return %c0_i32, %c0_i32_0 : i32, i32
  }
  func.func @transform_5(%arg0: i32) -> (i32, i32) {
    %c0_i32 = arith.constant 0 : i32
    %c0_i32_0 = arith.constant 0 : i32
    %c0_i32_1 = arith.constant 0 : i32
    return %c0_i32, %c0_i32_0 : i32, i32
  }
  func.func @transform_6(%arg0: i32) -> (i32, i32) {
    %c0_i32 = arith.constant 0 : i32
    %c0_i32_0 = arith.constant 0 : i32
    %c0_i32_1 = arith.constant 0 : i32
    return %c0_i32, %c0_i32_0 : i32, i32
  }
  func.func @transform_7(%arg0: i32) -> (i32, i32) {
    %c0_i32 = arith.constant 0 : i32
    %c0_i32_0 = arith.constant 0 : i32
    %c0_i32_1 = arith.constant 0 : i32
    return %c0_i32, %c0_i32_0 : i32, i32
  }
  func.func @transform_8(%arg0: i32) -> (i32, i32) {
    %c0_i32 = arith.constant 0 : i32
    %c0_i32_0 = arith.constant 0 : i32
    %c0_i32_1 = arith.constant 0 : i32
    return %c0_i32, %c0_i32_0 : i32, i32
  }
  func.func @transform_9(%arg0: i32) -> (i32, i32) {
    %c0_i32 = arith.constant 0 : i32
    %c0_i32_0 = arith.constant 0 : i32
    %c0_i32_1 = arith.constant 0 : i32
    return %c0_i32, %c0_i32_0 : i32, i32
  }
  func.func @transform_10(%arg0: i32) -> (i32, i32) {
    %c0_i32 = arith.constant 0 : i32
    %c0_i32_0 = arith.constant 0 : i32
    %c0_i32_1 = arith.constant 0 : i32
    return %c0_i32, %c0_i32_0 : i32, i32
  }
}

</mosaic_0001>

<bundles_post_ra>
// kernel: tpu_custom_call.1
= control target key start
LH: loop header
LB: loop body
LE: loop exit
PB: predicated region body
PF: predicated region fallthrough
CT: control target
= control target key end

     0   :  { %15 = vsyncpa [#allocation3], 0  ;;  %s1112_s0 = inlined_call_operand.hbm [shape: f32[16,128], index: 0, kind: input, shape index: {}]   ;;  %s1113_s1 = inlined_call_operand.hbm [shape: f32[16,16], index: 1, kind: input, shape index: {}]   ;;  %s1114_s2 = inlined_call_operand.vmem [shape: f32[1,128], index: 2, kind: input, shape index: {}]   ;;  %s1115_s3 = inlined_call_operand.vmem [shape: f32[1,128], index: 3, kind: input, shape index: {}]   ;;  %s1116_s4 = inlined_call_operand.hbm [shape: f32[128,128], index: 4, kind: input, shape index: {}]   ;;  %s1117_s5 = inlined_call_operand.vmem [shape: f32[1,128], index: 5, kind: input, shape index: {}]   ;;  %s1118_s6 = inlined_call_operand.vmem [shape: f32[1,128], index: 6, kind: input, shape index: {}]   ;;  %s1119_s7 = inlined_call_operand.vmem [shape: f32[1,128], index: 7, kind: input, shape index: {}]   ;;  %s1120_s8 = inlined_call_operand.hbm [shape: f32[128,128], index: 8, kind: input, shape index: {}]   ;;  %s1121_s9 = inlined_call_operand.vmem [shape: f32[1,128], index: 9, kind: input, shape index: {}]   ;;  %s1122_s10 = inlined_call_operand.hbm [shape: f32[16,128], index: 10, kind: output, shape index: {}]  }
   0x1   :  { %16 = vsyncpa [#allocation6], 0 }
   0x2   :  { %17 = vsyncpa [#allocation9], 0 }
   0x3   :  { %18 = vsyncpa [#allocation4], 0  ;;  %s923_s13 = smov [#allocation5]   ;;  %s924_s15 = smov [#allocation2]  }
   0x4   :  { %s36_s14 = sshll.u32 %s923_s13, 4  ;;  %s24_s16 = sshll.u32 %s924_s15, 4  ;;  %s37_s14 = int_to_ptr.vmem [resolvable:$true] %s36_s14  ;;  %s985_s16 = int_to_ptr.vmem [resolvable:$true] %s24_s16 }
   0x5   :  { %s805_s19 = scalar_lea.hbm %s1113_s1, 256 }
   0x6   :  { %p806_p0 = scmp.ne.s32.totalorder %s1113_s1, %s805_s19  ;;  %p809_p1 = scmp.lt.u32.totalorder %s805_s19, %s1113_s1 }
   0x8   :  { %p811_p2 = pnand %p809_p1, %p806_p0 }
   0xa   :  { %814 = shalt.err (!%p811_p2)
}
   0xb   :  { %s815_s24 = scalar_lea.vmem %s37_s14, 256  ;;  %p820_p4 = scmp.lt.s32.totalorder %s37_s14, %s37_s14 }
   0xc   :  { %p816_p3 = scmp.ne.s32.totalorder %s37_s14, %s815_s24  ;;  %p821_p5 = scmp.lt.s32.totalorder %s815_s24, %s815_s24 }
   0xe   :  { %p822_p6 = por %p821_p5, %p820_p4 }
  0x10   :  { %p823_p7 = pnand %p822_p6, %p816_p3 }
  0x12   :  { %826 = shalt.err (!%p823_p7)
}
  0x13   :  { %s925_s25 = smov 128   ;;  %s926_s26 = smov 8  }
  0x14   :  { %42 = dma.hbm_to_vmem [thread:$0]  %s1113_s1, 256, %s37_s14, [#allocation6], %s925_s25, %s925_s25, %s926_s26  }
  0x15   :  { %s827_s11 = scalar_lea.hbm %s1112_s0, 256 }
  0x16   :  { %p828_p8 = scmp.ne.s32.totalorder %s1112_s0, %s827_s11  ;;  %p831_p9 = scmp.lt.u32.totalorder %s827_s11, %s1112_s0 }
  0x18   :  { %p833_p10 = pnand %p831_p9, %p828_p8 }
  0x1a   :  { %836 = shalt.err (!%p833_p10)
}
  0x1b   :  { %s837_s18 = scalar_lea.vmem %s985_s16, 256  ;;  %p842_p12 = scmp.lt.s32.totalorder %s985_s16, %s985_s16 }
  0x1c   :  { %p838_p11 = scmp.ne.s32.totalorder %s985_s16, %s837_s18  ;;  %p843_p13 = scmp.lt.s32.totalorder %s837_s18, %s837_s18 }
  0x1e   :  { %p844_p0 = por %p843_p13, %p842_p12 }
  0x20   :  { %p845_p1 = pnand %p844_p0, %p838_p11 }
  0x22   :  { %848 = shalt.err (!%p845_p1)
}
  0x23   :  { %30 = dma.hbm_to_vmem [thread:$0]  %s1112_s0, 256, %s985_s16, [#allocation3], %s925_s25, %s925_s25, %s926_s26  }
  0x24   :  { %s927_s19 = smov [#allocation7]   ;;  %s928_s21 = smov [#allocation8]  }
  0x25   :  { %s52_s20 = sshll.u32 %s927_s19, 4  ;;  %s70_s22 = sshll.u32 %s928_s21, 4  ;;  %s53_s20 = int_to_ptr.vmem [resolvable:$true] %s52_s20  ;;  %s1022_s22 = int_to_ptr.vmem [resolvable:$true] %s70_s22 }
  0x26   :  { %s849_s27 = scalar_lea.hbm %s1116_s4, 2048 }
  0x27   :  { %p850_p2 = scmp.ne.s32.totalorder %s1116_s4, %s849_s27  ;;  %p853_p3 = scmp.lt.u32.totalorder %s849_s27, %s1116_s4 }
  0x29   :  { %p855_p4 = pnand %p853_p3, %p850_p2 }
  0x2b   :  { %858 = shalt.err (!%p855_p4)
}
  0x2c   :  { %s859_s0 = scalar_lea.vmem %s53_s20, 2048  ;;  %p864_p6 = scmp.lt.s32.totalorder %s53_s20, %s53_s20 }
  0x2d   :  { %p860_p5 = scmp.ne.s32.totalorder %s53_s20, %s859_s0  ;;  %p865_p7 = scmp.lt.s32.totalorder %s859_s0, %s859_s0 }
  0x2f   :  { %p866_p8 = por %p865_p7, %p864_p6 }
  0x31   :  { %p867_p9 = pnand %p866_p8, %p860_p5 }
  0x33   :  { %870 = shalt.err (!%p867_p9)
}
  0x34   :  { %58 = dma.hbm_to_vmem [thread:$0]  %s1116_s4, 2048, %s53_s20, [#allocation6], %s925_s25, %s925_s25, %s926_s26  }
  0x35   :  { %s871_s17 = scalar_lea.hbm %s1120_s8, 2048 }
  0x36   :  { %p872_p10 = scmp.ne.s32.totalorder %s1120_s8, %s871_s17  ;;  %p875_p11 = scmp.lt.u32.totalorder %s871_s17, %s1120_s8 }
  0x38   :  { %p877_p12 = pnand %p875_p11, %p872_p10 }
  0x3a   :  { %880 = shalt.err (!%p877_p12)
}
  0x3b   :  { %s881_s21 = scalar_lea.vmem %s1022_s22, 2048  ;;  %p886_p0 = scmp.lt.s32.totalorder %s1022_s22, %s1022_s22 }
  0x3c   :  { %p882_p13 = scmp.ne.s32.totalorder %s1022_s22, %s881_s21  ;;  %p887_p1 = scmp.lt.s32.totalorder %s881_s21, %s881_s21 }
  0x3e   :  { %p888_p2 = por %p887_p1, %p886_p0 }
  0x40   :  { %p889_p3 = pnand %p888_p2, %p882_p13 }
  0x42   :  { %892 = shalt.err (!%p889_p3)
}
  0x43   :  { %76 = dma.hbm_to_vmem [thread:$0]  %s1120_s8, 2048, %s1022_s22, [#allocation9], %s925_s25, %s925_s25, %s926_s26  }
  0x44   :  { %915 = dma.done.wait [#allocation3], 256  }
  0x45   :  { %916 = vsyncadd [#allocation3], 4294967040 }
  0x46   :  { %917 = dma.done.wait [#allocation6], 2304  }
  0x47   :  { %918 = vsyncadd [#allocation6], 4294964992 }
  0x48   :  { %919 = dma.done.wait [#allocation9], 2048  }
  0x49   :  { %920 = vsyncadd [#allocation9], 4294965248  ;;  %v140_v0 = vld [vmem:[#allocation7] sm:$0xff]  ;;  %v141_v1 = vld [vmem:[#allocation7 + $0x8] sm:$0xff]  ;;  %vm238_vm0 = vcmask 130048  }
  0x4a   :  { %v142_v2 = vld [vmem:[#allocation7 + $0x10] sm:$0xff]  ;;  %v720_v3 = vpack.c.bf16 %v141_v1, %v140_v0  ;;  %v143_v4 = vld [vmem:[#allocation7 + $0x18] sm:$0xff]  ;;  %v144_v6 = vld [vmem:[#allocation7 + $0x20] sm:$0xff] }
  0x4b   :  { %v724_v5 = vpack.c.bf16 %v143_v4, %v142_v2  ;;  %v145_v7 = vld [vmem:[#allocation7 + $0x28] sm:$0xff]  ;;  %v91_v9 = vld [vmem:[#allocation2] sm:$0xff]  ;;  %v146_v11 = vld [vmem:[#allocation7 + $0x30] sm:$0xff] }
  0x4c   :  { %721 = vmatprep.subr.bf16.mxu0 %v720_v3  ;;  %v728_v8 = vpack.c.bf16 %v145_v7, %v144_v6  ;;  %v92_v10 = vld [vmem:[#allocation2 + $0x8] sm:$0xff]  ;;  %v147_v12 = vld [vmem:[#allocation7 + $0x38] sm:$0xff]  ;;  %v103_v14 = vmul.f32 %v91_v9, %v91_v9  ;;  %v148_v19 = vld [vmem:[#allocation7 + $0x40] sm:$0xff] }
  0x4d   :  { %723 = vmatpush3.bf16.msra.mxu0 %v720_v3  ;;  %v95_v13 = vadd.f32 %v92_v10, %v91_v9  ;;  %v104_v15 = vmul.f32 %v92_v10, %v92_v10  ;;  %v732_v18 = vpack.c.bf16 %v147_v12, %v146_v11  ;;  %v149_v20 = vld [vmem:[#allocation7 + $0x48] sm:$0xff]  ;;  %v150_v26 = vld [vmem:[#allocation7 + $0x50] sm:$0xff]  ;;  %v151_v27 = vld [vmem:[#allocation7 + $0x58] sm:$0xff] }
  0x4e   :  { %725 = vmatprep.subr.bf16.mxu0 %v724_v5  ;;  %v736_v25 = vpack.c.bf16 %v149_v20, %v148_v19  ;;  %v740_v32 = vpack.c.bf16 %v151_v27, %v150_v26  ;;  %v152_v33 = vld [vmem:[#allocation7 + $0x60] sm:$0xff]  ;;  %v153_v34 = vld [vmem:[#allocation7 + $0x68] sm:$0xff]  ;;  %v154_v40 = vld [vmem:[#allocation7 + $0x70] sm:$0xff] }
  0x4f   :  { %v96_v16 = vrot.slane %v95_v13, 4  ;;  %v105_v17 = vadd.f32 %v104_v15, %v103_v14  ;;  %v744_v39 = vpack.c.bf16 %v153_v34, %v152_v33  ;;  %v155_v41 = vld [vmem:[#allocation7 + $0x78] sm:$0xff]  ;;  %v582_v51 = vld [vmem:[%s1114_s2] ss:$0 sm:$0xff]  ;;  %v93_v59 = vld [vmem:[#allocation5] sm:$0xff] }
  0x50   :  { %v748_v45 = vpack.c.bf16 %v155_v41, %v154_v40  ;;  %v583_v54 = vld [vmem:[%s1115_s3] ss:$0 sm:$0xff]  ;;  %675 = vmatprep.mubr.msk.f32.mxu1 %vm238_vm0, %v93_v59  ;;  %v1067_v63 = vld [vmem:[#allocation5 + $0x8] sm:$0xff]  ;;  %v388_v26 = vld [vmem:[#allocation8 + $0x10] sm:$0xff] }
  0x51   :  { %727 = vmatpush3.bf16.msra.mxu0 %v724_v5  ;;  %v97_v21 = vadd.f32 %v96_v16, %v95_v13  ;;  %v106_v22 = vrot.slane %v105_v17, 4  ;;  %v584_v0 = vld [vmem:[%s1117_s5] ss:$0 sm:$0xff]  ;;  %v389_v27 = vld [vmem:[#allocation8 + $0x18] sm:$0xff] }
  0x52   :  { %729 = vmatprep.subr.bf16.mxu0 %v728_v8  ;;  %v393_v33 = vld [vmem:[#allocation8 + $0x38] sm:$0xff]  ;;  %v398_v41 = vld [vmem:[#allocation8 + $0x60] sm:$0xff] }
  0x53   :  { %v98_v23 = vrot.slane %v97_v21, 2  ;;  %v107_v24 = vadd.f32 %v106_v22, %v105_v17 }
  0x55   :  { %731 = vmatpush3.bf16.msra.mxu0 %v728_v8  ;;  %v99_v28 = vadd.f32 %v98_v23, %v97_v21  ;;  %v108_v29 = vrot.slane %v107_v24, 2  ;;  %v386_v23 = vld [vmem:[#allocation8] sm:$0xff] }
  0x56   :  { %733 = vmatprep.subr.bf16.mxu0 %v732_v18 }
  0x57   :  { %v100_v30 = vrot.slane %v99_v28, 1  ;;  %v109_v31 = vadd.f32 %v108_v29, %v107_v24  ;;  %v387_v24 = vld [vmem:[#allocation8 + $0x8] sm:$0xff]  ;;  %v390_v29 = vld [vmem:[#allocation8 + $0x20] sm:$0xff] }
  0x59   :  { %735 = vmatpush3.bf16.msra.mxu0 %v732_v18  ;;  %v101_v35 = vadd.f32 %v100_v30, %v99_v28  ;;  %v110_v36 = vrot.slane %v109_v31, 1  ;;  %v760_v28 = vpack.c.bf16 %v389_v27, %v388_v26  ;;  %v391_v30 = vld [vmem:[#allocation8 + $0x28] sm:$0xff] }
  0x5a   :  { %737 = vmatprep.subr.bf16.mxu0 %v736_v25 }
  0x5b   :  { %v102_v37 = vmul.f32 0.0625, %v101_v35  ;;  %v111_v38 = vadd.f32 %v110_v36, %v109_v31  ;;  %v764_v31 = vpack.c.bf16 %v391_v30, %v390_v29  ;;  %v394_v35 = vld [vmem:[#allocation8 + $0x40] sm:$0xff]  ;;  %v395_v36 = vld [vmem:[#allocation8 + $0x48] sm:$0xff] }
  0x5d   :  { %739 = vmatpush3.bf16.msra.mxu0 %v736_v25  ;;  %v112_v42 = vmul.f32 0.0625, %v111_v38  ;;  %v113_v43 = vmul.f32 %v102_v37, %v102_v37  ;;  %v116_v48 = vsub.f32 %v91_v9, %v102_v37  ;;  %v117_v49 = vsub.f32 %v92_v10, %v102_v37  ;;  %v396_v38 = vld [vmem:[#allocation8 + $0x50] sm:$0xff] }
  0x5e   :  { %741 = vmatprep.subr.bf16.mxu0 %v740_v32  ;;  %v756_v25 = vpack.c.bf16 %v387_v24, %v386_v23  ;;  %v772_v37 = vpack.c.bf16 %v395_v36, %v394_v35 }
  0x5f   :  { %v114_v44 = vsub.f32 %v112_v42, %v113_v43  ;;  %v399_v42 = vld [vmem:[#allocation8 + $0x68] sm:$0xff] }
  0x60   :  { %v780_v43 = vpack.c.bf16 %v399_v42, %v398_v41 }
  0x61   :  { %743 = vmatpush3.bf16.msra.mxu0 %v740_v32  ;;  %v115_v46 = vmax.f32 %v114_v44, 0.0  ;;  %v392_v32 = vld [vmem:[#allocation8 + $0x30] sm:$0xff] }
  0x62   :  { %745 = vmatprep.subr.bf16.mxu0 %v744_v39  ;;  %v768_v34 = vpack.c.bf16 %v393_v33, %v392_v32  ;;  %v400_v44 = vld [vmem:[#allocation8 + $0x70] sm:$0xff] }
  0x63   :  { %v118_v47 = vadd.f32 1e-05, %v115_v46 }
  0x65   :  { %747 = vmatpush3.bf16.msra.mxu0 %v744_v39  ;;  %799 = vrsqrt.f32 %v118_v47  ;;  %v397_v39 = vld [vmem:[#allocation8 + $0x58] sm:$0xff] }
  0x66   :  { %749 = vmatprep.subr.bf16.mxu0 %v748_v45  ;;  %v776_v40 = vpack.c.bf16 %v397_v39, %v396_v38 }
  0x69   :  { %751 = vmatpush3.bf16.msra.mxu0 %v748_v45  ;;  %v401_v45 = vld [vmem:[#allocation8 + $0x78] sm:$0xff] }
  0x6a   :  { %v784_v46 = vpack.c.bf16 %v401_v45, %v400_v44 }
  0x6f   :  { %v800_v50 = vpop.eup %799 }
  0x70   :  { %v120_v52 = vmul.f32 %v800_v50, %v116_v48  ;;  %v121_v53 = vmul.f32 %v800_v50, %v117_v49 }
  0x72   :  { %v129_v55 = vmul.f32 %v582_v51, %v120_v52  ;;  %v130_v56 = vmul.f32 %v582_v51, %v121_v53 }
  0x74   :  { %v138_v57 = vadd.f32 %v583_v54, %v129_v55  ;;  %v139_v58 = vadd.f32 %v583_v54, %v130_v56 }
  0x76   :  { %668 = vmatprep.mubr.f32.mxu0 %v138_v57 }
  0x77   :  { %669 = vmatmul.mubr.f32.vlgmr.msra.gmra.mrb[0].mxu0 %v139_v58 }
  0x78   :  { %717 = vmatprep.mubr.msk.f32.mxu0 %vm238_vm0, %v93_v59 }
 0x14a   :  { %v670_v60 = vpop.f32.mrb[0].mxu0 }
 0x14b   :  { %v222_v61 = vpop.f32.mrb[1].mxu0 }
 0x14c   :  { %v752_v62 = vpack.c.bf16 %v670_v60, %v222_v61 }
 0x14e   :  { %753 = vmatprep.subr.bf16.mxu1 %v752_v62 }
 0x14f   :  { %755 = vmatpush3.bf16.msra.mxu1 %v752_v62 }
 0x150   :  { %757 = vmatprep.subr.bf16.mxu1 %v756_v25 }
 0x152   :  { %676 = vmatmul.mubr.msk.f32.vlgmr.msra.gmra.mrb[0].mxu1 %vm238_vm0, %v1067_v63 }
 0x153   :  { %759 = vmatpush3.bf16.msra.mxu1 %v756_v25 }
 0x154   :  { %761 = vmatprep.subr.bf16.mxu1 %v760_v28 }
 0x157   :  { %763 = vmatpush3.bf16.msra.mxu1 %v760_v28 }
 0x158   :  { %765 = vmatprep.subr.bf16.mxu1 %v764_v31 }
 0x15b   :  { %767 = vmatpush3.bf16.msra.mxu1 %v764_v31 }
 0x15c   :  { %769 = vmatprep.subr.bf16.mxu1 %v768_v34 }
 0x15f   :  { %771 = vmatpush3.bf16.msra.mxu1 %v768_v34 }
 0x160   :  { %773 = vmatprep.subr.bf16.mxu1 %v772_v37 }
 0x163   :  { %775 = vmatpush3.bf16.msra.mxu1 %v772_v37 }
 0x164   :  { %777 = vmatprep.subr.bf16.mxu1 %v776_v40 }
 0x167   :  { %779 = vmatpush3.bf16.msra.mxu1 %v776_v40 }
 0x168   :  { %781 = vmatprep.subr.bf16.mxu1 %v780_v43 }
 0x16b   :  { %783 = vmatpush3.bf16.msra.mxu1 %v780_v43 }
 0x16c   :  { %785 = vmatprep.subr.bf16.mxu1 %v784_v46 }
 0x16f   :  { %787 = vmatpush3.bf16.msra.mxu1 %v784_v46 }
 0x225   :  { %v677_v1 = vpop.f32.mrb[0].mxu1 }
 0x226   :  { %v317_v2 = vadd.f32 %v677_v1, %v584_v0  ;;  %v311_v3 = vpop.f32.mrb[1].mxu1 }
 0x227   :  { %v312_v4 = vadd.f32 %v584_v0, %v311_v3  ;;  %v587_v0 = vld [vmem:[%s1118_s6] ss:$0 sm:$0xff] }
 0x228   :  { %v1074_v5 = vmax.f32 %v317_v2, 0.0  ;;  %v588_v3 = vld [vmem:[%s1119_s7] ss:$0 sm:$0xff]  ;;  %s929_s7 = smov [#allocation10]  }
 0x229   :  { %v1076_v6 = vmax.f32 %v312_v4, 0.0  ;;  %s568_s11 = sshll.u32 %s929_s7, 4  ;;  %s569_s11 = int_to_ptr.vmem [resolvable:$true] %s568_s11 }
 0x22a   :  { %v339_v7 = vmul.f32 %v1074_v5, %v1074_v5  ;;  %s893_s0 = scalar_lea.vmem %s569_s11, 256  ;;  %p898_p5 = scmp.lt.s32.totalorder %s569_s11, %s569_s11 }
 0x22b   :  { %v329_v8 = vadd.f32 %v1074_v5, %v1076_v6  ;;  %v338_v9 = vmul.f32 %v1076_v6, %v1076_v6  ;;  %p894_p4 = scmp.ne.s32.totalorder %s569_s11, %s893_s0  ;;  %p899_p6 = scmp.lt.s32.totalorder %s893_s0, %s893_s0 }
 0x22d   :  { %v330_v10 = vrot.slane %v329_v8, 4  ;;  %v340_v11 = vadd.f32 %v339_v7, %v338_v9  ;;  %p900_p7 = por %p899_p6, %p898_p5 }
 0x22f   :  { %v331_v12 = vadd.f32 %v330_v10, %v329_v8  ;;  %v341_v13 = vrot.slane %v340_v11, 4  ;;  %p901_p8 = pnand %p900_p7, %p894_p4 }
 0x231   :  { %v332_v14 = vrot.slane %v331_v12, 2  ;;  %v342_v15 = vadd.f32 %v341_v13, %v340_v11  ;;  %v589_v11 = vld [vmem:[%s1121_s9] ss:$0 sm:$0xff] }
 0x233   :  { %v333_v16 = vadd.f32 %v332_v14, %v331_v12  ;;  %v343_v17 = vrot.slane %v342_v15, 2 }
 0x235   :  { %v334_v18 = vrot.slane %v333_v16, 1  ;;  %v344_v19 = vadd.f32 %v343_v17, %v342_v15 }
 0x237   :  { %v335_v20 = vadd.f32 %v334_v18, %v333_v16  ;;  %v345_v21 = vrot.slane %v344_v19, 1 }
 0x239   :  { %336 = vadd.xlane.f32.xlu0 %v335_v20  ;;  %v346_v22 = vadd.f32 %v345_v21, %v344_v19 }
 0x23d   :  { %347 = vadd.xlane.f32.xlu0 %v346_v22 }
 0x2c6   :  { %v337_v47 = vpop.xlane.xlu0 %336 }
 0x2c7   :  { %v349_v48 = vmul.f32 0.0052083335, %v337_v47 }
 0x2c9   :  { %v351_v50 = vmul.f32 %v349_v48, %v349_v48  ;;  %v364_v60 = vsub.f32 %v1076_v6, %v349_v48  ;;  %v365_v61 = vsub.f32 %v1074_v5, %v349_v48 }
 0x2ca   :  { %v348_v49 = vpop.xlane.xlu0 %347 }
 0x2cb   :  { %v350_v51 = vmul.f32 0.0052083335, %v348_v49 }
 0x2cd   :  { %v352_v52 = vsub.f32 %v350_v51, %v351_v50 }
 0x2cf   :  { %v353_v53 = vmax.f32 %v352_v52, 0.0 }
 0x2d1   :  { %801 = vrsqrt.f32 %v353_v53  ;;  %vm356_vm1 = vcmp.eq.f32.partialorder %v353_v53, inf  ;;  %v359_v56 = vand.u32 2147483648, %v353_v53  ;;  %vm358_vm2 = vcmp.eq.f32.partialorder %v353_v53, 0.0 }
 0x2db   :  { %v802_v54 = vpop.eup %801 }
 0x2dc   :  { %v355_v55 = vmul.f32 %v802_v54, %v353_v53 }
 0x2de   :  { %v357_v57 = vsel %vm356_vm1, %v353_v53, %v355_v55 }
 0x2df   :  { %v360_v58 = vsel %vm358_vm2, %v359_v56, %v357_v57 }
 0x2e0   :  { %v361_v59 = vadd.f32 1e-05, %v360_v58 }
 0x2e2   :  { %803 = vrcp.f32 %v361_v59 }
 0x2ec   :  { %v804_v62 = vpop.eup %803 }
 0x2ed   :  { %v366_v1 = vmul.f32 %v804_v62, %v364_v60  ;;  %v367_v2 = vmul.f32 %v804_v62, %v365_v61 }
 0x2ef   :  { %v375_v4 = vmul.f32 %v587_v0, %v366_v1  ;;  %v376_v7 = vmul.f32 %v587_v0, %v367_v2 }
 0x2f1   :  { %v384_v8 = vadd.f32 %v588_v3, %v375_v4  ;;  %v385_v9 = vadd.f32 %v588_v3, %v376_v7 }
 0x2f3   :  { %710 = vmatprep.mubr.f32.mxu1 %v384_v8 }
 0x2f4   :  { %711 = vmatmul.mubr.f32.vlgmr.msra.gmra.mrb[2].mxu1 %v385_v9 }
 0x3c7   :  { %v712_v6 = vpop.f32.mrb[2].mxu1 }
 0x3c8   :  { %v468_v10 = vpop.f32.mrb[3].mxu1 }
 0x3c9   :  { %v788_v5 = vpack.c.bf16 %v712_v6, %v468_v10 }
 0x3cb   :  { %789 = vmatprep.subr.bf16.mxu0 %v788_v5 }
 0x3cc   :  { %791 = vmatpush3.bf16.msra.mxu0 %v788_v5 }
 0x3cf   :  { %718 = vmatmul.mubr.msk.f32.vlgmr.msra.gmra.mrb[2].mxu0 %vm238_vm0, %v1067_v63 }
 0x4a2   :  { %v719_v12 = vpop.f32.mrb[2].mxu0 }
 0x4a3   :  { %v556_v13 = vadd.f32 %v719_v12, %v589_v11  ;;  %v550_v14 = vpop.f32.mrb[3].mxu0 }
 0x4a4   :  { %v551_v15 = vadd.f32 %v589_v11, %v550_v14 }
 0x4a5   :  { %v560_v16 = vmax.f32 %v556_v13, 0.0 }
 0x4a6   :  { %v559_v17 = vmax.f32 %v551_v15, 0.0 }
 0x4a7   :  { %562 = vst [vmem:[#allocation10 + $0x8] sm:$0xff] %v560_v16 }
 0x4a8   :  { %561 = vst [vmem:[#allocation10] sm:$0xff] %v559_v17 }
 0x4a9   :  { %904 = shalt.err (!%p901_p8)
}
 0x4aa   :  { %s905_s12 = scalar_lea.hbm %s1122_s10, 256 }
 0x4ab   :  { %p906_p9 = scmp.ne.s32.totalorder %s1122_s10, %s905_s12  ;;  %p909_p10 = scmp.lt.u32.totalorder %s905_s12, %s1122_s10 }
 0x4ad   :  { %p911_p11 = pnand %p909_p10, %p906_p9 }
 0x4af   :  { %914 = shalt.err (!%p911_p11)
}
 0x4b0   :  { %574 = dma.vmem_to_hbm [thread:$0]  %s569_s11, 256, %s1122_s10, [#allocation4], %s925_s25, %s925_s25, %s926_s26  }
 0x4b1   :  { %921 = dma.done.wait [#allocation4], 256  }
 0x4b2   :  { %922 = vsyncadd [#allocation4], 4294967040 }
 0x4b3   :  { %578 = vsyncpa [#allocation3], 1 }
 0x4b4   :  { %579 = vsyncpa [#allocation6], 1 }
 0x4b5   :  { %580 = vsyncpa [#allocation9], 1 }
 0x4b6   :  { %581 = vsyncpa [#allocation4], 1 }

</bundles_post_ra>
